<compile_context>
chip_gen: v6e
topology: v6e:2x2x1
jax: 0.10.0
libtpu: 0.0.40
codegen_flags: <defaults>
</compile_context>

<pallas_src>
import functools

import jax
import jax.numpy as jnp
from jax.experimental import pallas as pl
from jax.experimental.pallas import tpu as pltpu


def fused_conv_bn_relu_kernel(x_ref, p_ref, o_ref, y_scr, sem, *,
                              cin, n_pixels, chunks, eps):
    """1x1 conv + batch-norm (batch stats) + relu, streamed in column chunks.

    x_ref:  (Cin,  P)      channels-major pixels, VMEM block
    p_ref:  (Cout, Cin+3)  packed params [w | b | gamma | beta], VMEM block
    o_ref:  (Cout, P)      output in HBM (pl.ANY) -- written via manual DMA
    y_scr:  (Cout, P)      VMEM scratch holding the conv output
    sem:    (n_chunks,)    DMA semaphores for the chunked write-back
    """
    # Hoisted per-channel parameters (tiny (Cout, 1) slices).
    w_cols = [p_ref[:, c:c + 1] for c in range(cin)]
    b = p_ref[:, cin:cin + 1]
    g = p_ref[:, cin + 1:cin + 2]
    beta = p_ref[:, cin + 2:cin + 3]

    inv_n = 1.0 / float(n_pixels)

    # ---- Pass A: 1x1 conv per chunk -> y scratch, accumulate channel sums.
    # Cin == 3, so the channel mix is 3 broadcast FMAs on the VPU rather than
    # a <1%-utilized MXU matmul.
    s1 = jnp.zeros_like(b)
    for (c0, w) in chunks:
        xc = x_ref[:, pl.ds(c0, w)]                       # (Cin, w)
        y = w_cols[0] * xc[0:1, :] + b                    # (Cout, w)
        for c in range(1, cin):
            y = y + w_cols[c] * xc[c:c + 1, :]
        y_scr[:, pl.ds(c0, w)] = y
        s1 = s1 + jnp.sum(y, axis=1, keepdims=True)
    mean = s1 * inv_n                                     # (Cout, 1)

    # ---- Pass B: centered sum of squares, read-only (stable two-pass var,
    # no centered tensor is ever written back to VMEM).
    s2 = jnp.zeros_like(b)
    for (c0, w) in chunks:
        yc = y_scr[:, pl.ds(c0, w)] - mean
        s2 = s2 + jnp.sum(yc * yc, axis=1, keepdims=True)
    var = s2 * inv_n

    scale = g * jax.lax.rsqrt(var + eps)                  # (Cout, 1)
    shift = beta - mean * scale                           # centering folded in

    # ---- Pass C: BN apply + ReLU per chunk, then stream the chunk to HBM so
    # write-back overlaps the remaining epilogue compute.
    copies = []
    for i, (c0, w) in enumerate(chunks):
        y_scr[:, pl.ds(c0, w)] = jnp.maximum(
            y_scr[:, pl.ds(c0, w)] * scale + shift, 0.0)
        cp = pltpu.make_async_copy(y_scr.at[:, pl.ds(c0, w)],
                                   o_ref.at[:, pl.ds(c0, w)],
                                   sem.at[i])
        cp.start()
        copies.append(cp)
    for cp in copies:
        cp.wait()


def model_forward(x, w, b, gamma, beta, eps=1e-5):
    """x: (N, Cin, H, W) float32 NCHW.  Returns (N, Cout, H+2, W+2) NCHW."""
    N, Cin, H, W = x.shape
    Cout = w.shape[0]

    # padding=1 on spatial dims (the 1x1 conv just sees extra zero pixels).
    xp = jnp.pad(x, ((0, 0), (0, 0), (1, 1), (1, 1))).astype(jnp.float32)
    Hp, Wp = H + 2, W + 2
    P = N * Hp * Wp

    # Channels-major flattened view (Cin, P).  For N == 1 (the spec's shape)
    # this is a free reshape of NCHW -- no transpose, no lane padding.
    if N == 1:
        xf = xp.reshape(Cin, P)
    else:
        xf = jnp.transpose(xp, (1, 0, 2, 3)).reshape(Cin, P)

    # Single packed per-channel parameter array: [w (Cin) | b | gamma | beta].
    params = jnp.concatenate(
        [w.reshape(Cout, Cin).astype(jnp.float32),
         b.reshape(Cout, 1).astype(jnp.float32),
         gamma.reshape(Cout, 1).astype(jnp.float32),
         beta.reshape(Cout, 1).astype(jnp.float32)], axis=1)   # (Cout, Cin+3)

    # Static chunking of the pixel axis (multiples of 128, ragged tail).
    CHUNK = 1024
    chunks, c0 = [], 0
    while c0 < P:
        wdt = min(CHUNK, P - c0)
        chunks.append((c0, wdt))
        c0 += wdt
    chunks = tuple(chunks)
    n_chunks = len(chunks)

    cost = pl.CostEstimate(
        flops=(2 * Cin + 8) * Cout * P,
        transcendentals=Cout,
        bytes_accessed=4 * (Cin * P + Cout * P + Cout * (Cin + 3)))

    out = pl.pallas_call(
        functools.partial(fused_conv_bn_relu_kernel,
                          cin=Cin, n_pixels=P, chunks=chunks, eps=eps),
        out_shape=jax.ShapeDtypeStruct((Cout, P), jnp.float32),
        grid=(1,),
        in_specs=[
            pl.BlockSpec((Cin, P), lambda i: (0, 0)),          # full block
            pl.BlockSpec((Cout, Cin + 3), lambda i: (0, 0)),   # packed params
        ],
        out_specs=pl.BlockSpec(memory_space=pl.ANY),           # HBM, manual DMA
        scratch_shapes=[
            pltpu.VMEM((Cout, P), jnp.float32),
            pltpu.SemaphoreType.DMA((n_chunks,)),
        ],
        compiler_params=pltpu.CompilerParams(
            dimension_semantics=("arbitrary",)),
        cost_estimate=cost,
    )(xf, params)

    # (Cout, P) -> NCHW, no slicing needed (output was never padded).
    if N == 1:
        out = out.reshape(1, Cout, Hp, Wp)
    else:
        out = jnp.transpose(out.reshape(Cout, N, Hp, Wp), (1, 0, 2, 3))
    return out


def reference_forward(x, w, b, gamma, beta, eps=1e-5):
    """Pure-JAX reference (same math, no Pallas)."""
    xp = jnp.pad(x, ((0, 0), (0, 0), (1, 1), (1, 1)))
    v1 = jnp.einsum("nchw,oc->nohw", xp, w.reshape(w.shape[0], w.shape[1]))
    v1 = v1 + b[None, :, None, None]
    mean = v1.mean(axis=(0, 2, 3), keepdims=True)
    var = ((v1 - mean) ** 2).mean(axis=(0, 2, 3), keepdims=True)
    v2 = (v1 - mean) / jnp.sqrt(var + eps)
    v2 = v2 * gamma[None, :, None, None] + beta[None, :, None, None]
    return jnp.maximum(v2, 0.0)


if __name__ == "__main__":
    key = jax.random.PRNGKey(0)
    k_x, k_w, k_b = jax.random.split(key, 3)

    # Spec shape is (1, 3, 128, 128); keep N/C, shrink spatial for the test.
    N, Cin, H, W = 1, 3, 16, 16
    Cout = 16

    x = jax.random.normal(k_x, (N, Cin, H, W), dtype=jnp.float32)
    # Conv2d(3, 16, 1) params: weight (16, 3, 1, 1), bias (16,)
    w = jax.random.normal(k_w, (Cout, Cin, 1, 1), dtype=jnp.float32) * 0.1
    b = jax.random.normal(k_b, (Cout,), dtype=jnp.float32) * 0.1
    # BatchNorm affine params (PyTorch default init: gamma=1, beta=0)
    gamma = jnp.ones((Cout,), dtype=jnp.float32)
    beta = jnp.zeros((Cout,), dtype=jnp.float32)

    out = jax.block_until_ready(model_forward(x, w, b, gamma, beta))
    ref = reference_forward(x, w, b, gamma, beta)

    assert out.shape == (N, Cout, H + 2, W + 2), out.shape
    assert jnp.allclose(out, ref, rtol=1e-3, atol=1e-3), float(
        jnp.max(jnp.abs(out - ref))
    )

    print("KERNEL_OK")
</pallas_src>

<mosaic_0001>
module attributes {stable_mosaic.version = 11 : i64} {
  func.func @fused_conv_bn_relu_kernel(%arg0: i32, %arg1: memref<3x324xf32, #tpu.memory_space<vmem>>, %arg2: memref<16x6xf32, #tpu.memory_space<vmem>>, %arg3: memref<16x324xf32, #tpu.memory_space<any>>, %arg4: memref<16x324xf32, #tpu.memory_space<vmem>>, %arg5: memref<1x!tpu.dma_semaphore, #tpu.memory_space<semaphore_mem>>) attributes {dimension_semantics = [#tpu.dimension_semantics<arbitrary>], iteration_bounds = array<i64: 1>, scalar_prefetch = 0 : i64, scratch_operands = 2 : i64, tpu.core_type = #tpu.core_type<tc>, window_params = [{pipeline_mode = #tpu.pipeline_mode<synchronous>, transform_indices = @transform_0, window_bounds = array<i64: 3, 324>}, {pipeline_mode = #tpu.pipeline_mode<synchronous>, transform_indices = @transform_1, window_bounds = array<i64: 16, 6>}, {}]} {
    %c0 = arith.constant 0 : index
    %c0_0 = arith.constant 0 : index
    %0 = vector.load %arg2[%c0, %c0_0] : memref<16x6xf32, #tpu.memory_space<vmem>>, vector<16x1xf32>
    %c0_1 = arith.constant 0 : index
    %c1 = arith.constant 1 : index
    %1 = vector.load %arg2[%c0_1, %c1] : memref<16x6xf32, #tpu.memory_space<vmem>>, vector<16x1xf32>
    %c0_2 = arith.constant 0 : index
    %c2 = arith.constant 2 : index
    %2 = vector.load %arg2[%c0_2, %c2] : memref<16x6xf32, #tpu.memory_space<vmem>>, vector<16x1xf32>
    %c0_3 = arith.constant 0 : index
    %c3 = arith.constant 3 : index
    %3 = vector.load %arg2[%c0_3, %c3] : memref<16x6xf32, #tpu.memory_space<vmem>>, vector<16x1xf32>
    %c0_4 = arith.constant 0 : index
    %c4 = arith.constant 4 : index
    %4 = vector.load %arg2[%c0_4, %c4] : memref<16x6xf32, #tpu.memory_space<vmem>>, vector<16x1xf32>
    %c0_5 = arith.constant 0 : index
    %c5 = arith.constant 5 : index
    %5 = vector.load %arg2[%c0_5, %c5] : memref<16x6xf32, #tpu.memory_space<vmem>>, vector<16x1xf32>
    %cst = arith.constant 0.000000e+00 : f32
    %6 = vector.broadcast %cst : f32 to vector<16x1xf32>
    %c0_6 = arith.constant 0 : index
    %c0_7 = arith.constant 0 : index
    %7 = vector.load %arg1[%c0_6, %c0_7] : memref<3x324xf32, #tpu.memory_space<vmem>>, vector<3x324xf32>
    %8 = vector.extract_strided_slice %7 {offsets = [0, 0], sizes = [1, 324], strides = [1, 1]} : vector<3x324xf32> to vector<1x324xf32>
    %9 = vector.broadcast %0 : vector<16x1xf32> to vector<16x324xf32>
    %10 = vector.broadcast %8 : vector<1x324xf32> to vector<16x324xf32>
    %11 = arith.mulf %9, %10 : vector<16x324xf32>
    %12 = vector.broadcast %3 : vector<16x1xf32> to vector<16x324xf32>
    %13 = arith.addf %11, %12 : vector<16x324xf32>
    %14 = vector.extract_strided_slice %7 {offsets = [1, 0], sizes = [1, 324], strides = [1, 1]} : vector<3x324xf32> to vector<1x324xf32>
    %15 = vector.broadcast %1 : vector<16x1xf32> to vector<16x324xf32>
    %16 = vector.broadcast %14 : vector<1x324xf32> to vector<16x324xf32>
    %17 = arith.mulf %15, %16 : vector<16x324xf32>
    %18 = arith.addf %13, %17 : vector<16x324xf32>
    %19 = vector.extract_strided_slice %7 {offsets = [2, 0], sizes = [1, 324], strides = [1, 1]} : vector<3x324xf32> to vector<1x324xf32>
    %20 = vector.broadcast %2 : vector<16x1xf32> to vector<16x324xf32>
    %21 = vector.broadcast %19 : vector<1x324xf32> to vector<16x324xf32>
    %22 = arith.mulf %20, %21 : vector<16x324xf32>
    %23 = arith.addf %18, %22 : vector<16x324xf32>
    %c0_8 = arith.constant 0 : index
    %c0_9 = arith.constant 0 : index
    %24 = vector.load %arg4[%c0_8, %c0_9] : memref<16x324xf32, #tpu.memory_space<vmem>>, vector<16x324xf32>
    tpu.vector_store %arg4[%c0_8, %c0_9], %23 {strides = array<i32>} : memref<16x324xf32, #tpu.memory_space<vmem>>, vector<16x324xf32>,
    %cst_10 = arith.constant dense<0.000000e+00> : vector<16xf32>
    %25 = vector.multi_reduction <add>, %23, %cst_10 [1] : vector<16x324xf32> to vector<16xf32>
    %26 = vector.shape_cast %25 : vector<16xf32> to vector<16x1xf32>
    %27 = arith.addf %6, %26 : vector<16x1xf32>
    %cst_11 = arith.constant 0.00308641978 : f32
    %28 = vector.broadcast %cst_11 : f32 to vector<16x1xf32>
    %29 = arith.mulf %27, %28 : vector<16x1xf32>
    %cst_12 = arith.constant 0.000000e+00 : f32
    %30 = vector.broadcast %cst_12 : f32 to vector<16x1xf32>
    %c0_13 = arith.constant 0 : index
    %c0_14 = arith.constant 0 : index
    %31 = vector.load %arg4[%c0_13, %c0_14] : memref<16x324xf32, #tpu.memory_space<vmem>>, vector<16x324xf32>
    %32 = vector.broadcast %29 : vector<16x1xf32> to vector<16x324xf32>
    %33 = arith.subf %31, %32 : vector<16x324xf32>
    %34 = arith.mulf %33, %33 : vector<16x324xf32>
    %cst_15 = arith.constant dense<0.000000e+00> : vector<16xf32>
    %35 = vector.multi_reduction <add>, %34, %cst_15 [1] : vector<16x324xf32> to vector<16xf32>
    %36 = vector.shape_cast %35 : vector<16xf32> to vector<16x1xf32>
    %37 = arith.addf %30, %36 : vector<16x1xf32>
    %cst_16 = arith.constant 0.00308641978 : f32
    %38 = vector.broadcast %cst_16 : f32 to vector<16x1xf32>
    %39 = arith.mulf %37, %38 : vector<16x1xf32>
    %cst_17 = arith.constant 9.99999974E-6 : f32
    %40 = vector.broadcast %cst_17 : f32 to vector<16x1xf32>
    %41 = arith.addf %39, %40 : vector<16x1xf32>
    %42 = math.rsqrt %41 : vector<16x1xf32>
    %43 = arith.mulf %4, %42 : vector<16x1xf32>
    %44 = arith.mulf %29, %43 : vector<16x1xf32>
    %45 = arith.subf %5, %44 : vector<16x1xf32>
    %c0_18 = arith.constant 0 : index
    %c0_19 = arith.constant 0 : index
    %46 = vector.load %arg4[%c0_18, %c0_19] : memref<16x324xf32, #tpu.memory_space<vmem>>, vector<16x324xf32>
    %47 = vector.broadcast %43 : vector<16x1xf32> to vector<16x324xf32>
    %48 = arith.mulf %46, %47 : vector<16x324xf32>
    %49 = vector.broadcast %45 : vector<16x1xf32> to vector<16x324xf32>
    %50 = arith.addf %48, %49 : vector<16x324xf32>
    %cst_20 = arith.constant 0.000000e+00 : f32
    %51 = vector.broadcast %cst_20 : f32 to vector<16x324xf32>
    %52 = arith.maximumf %50, %51 : vector<16x324xf32>
    %c0_21 = arith.constant 0 : index
    %c0_22 = arith.constant 0 : index
    %53 = vector.load %arg4[%c0_21, %c0_22] : memref<16x324xf32, #tpu.memory_space<vmem>>, vector<16x324xf32>
    tpu.vector_store %arg4[%c0_21, %c0_22], %52 {strides = array<i32>} : memref<16x324xf32, #tpu.memory_space<vmem>>, vector<16x324xf32>,
    %c0_i32 = arith.constant 0 : i32
    %c0_i32_23 = arith.constant 0 : i32
    %c0_i32_24 = arith.constant 0 : i32
    %54 = tpu.memref_slice %arg4[%c0_i32_23, %c0_i32_24] : memref<16x324xf32, #tpu.memory_space<vmem>> -> memref<16x324xf32, #tpu.memory_space<vmem>>
    %c0_i32_25 = arith.constant 0 : i32
    %c0_i32_26 = arith.constant 0 : i32
    %55 = tpu.memref_slice %arg3[%c0_i32_25, %c0_i32_26] : memref<16x324xf32, #tpu.memory_space<any>> -> memref<16x324xf32, #tpu.memory_space<any>>
    %56 = tpu.memref_slice %arg5[%c0_i32] : memref<1x!tpu.dma_semaphore, #tpu.memory_space<semaphore_mem>> -> memref<1x!tpu.dma_semaphore, #tpu.memory_space<semaphore_mem>>
    %57 = tpu.memref_squeeze %56 : memref<1x!tpu.dma_semaphore, #tpu.memory_space<semaphore_mem>> -> memref<!tpu.dma_semaphore, #tpu.memory_space<semaphore_mem>>
    tpu.enqueue_dma source(%54 : memref<16x324xf32, #tpu.memory_space<vmem>>) target(%55 : memref<16x324xf32, #tpu.memory_space<any>>) target_semaphore(%57 : memref<!tpu.dma_semaphore, #tpu.memory_space<semaphore_mem>>)
    %c0_i32_27 = arith.constant 0 : i32
    %c0_i32_28 = arith.constant 0 : i32
    %c0_i32_29 = arith.constant 0 : i32
    %58 = tpu.memref_slice %arg4[%c0_i32_28, %c0_i32_29] : memref<16x324xf32, #tpu.memory_space<vmem>> -> memref<16x324xf32, #tpu.memory_space<vmem>>
    %c0_i32_30 = arith.constant 0 : i32
    %c0_i32_31 = arith.constant 0 : i32
    %59 = tpu.memref_slice %arg3[%c0_i32_30, %c0_i32_31] : memref<16x324xf32, #tpu.memory_space<any>> -> memref<16x324xf32, #tpu.memory_space<any>>
    %60 = tpu.memref_slice %arg5[%c0_i32_27] : memref<1x!tpu.dma_semaphore, #tpu.memory_space<semaphore_mem>> -> memref<1x!tpu.dma_semaphore, #tpu.memory_space<semaphore_mem>>
    %61 = tpu.memref_squeeze %60 : memref<1x!tpu.dma_semaphore, #tpu.memory_space<semaphore_mem>> -> memref<!tpu.dma_semaphore, #tpu.memory_space<semaphore_mem>>
    tpu.wait_dma2 semaphore(%61 : memref<!tpu.dma_semaphore, #tpu.memory_space<semaphore_mem>>) src(%58 : memref<16x324xf32, #tpu.memory_space<vmem>>) dst(%59 : memref<16x324xf32, #tpu.memory_space<any>>)
    return
  }
  func.func @transform_0(%arg0: i32) -> (i32, i32) {
    %c0_i32 = arith.constant 0 : i32
    %c0_i32_0 = arith.constant 0 : i32
    %c0_i32_1 = arith.constant 0 : i32
    return %c0_i32, %c0_i32_0 : i32, i32
  }
  func.func @transform_1(%arg0: i32) -> (i32, i32) {
    %c0_i32 = arith.constant 0 : i32
    %c0_i32_0 = arith.constant 0 : i32
    %c0_i32_1 = arith.constant 0 : i32
    return %c0_i32, %c0_i32_0 : i32, i32
  }
}

</mosaic_0001>

<bundles_post_ra>
// kernel: tpu_custom_call.1
= control target key start
LH: loop header
LB: loop body
LE: loop exit
PB: predicated region body
PF: predicated region fallthrough
CT: control target
= control target key end

     0   :  { %v348_v0 = vmov 3   ;;  %v349_v1 = vmov 0   ;;  %v350_v4 = vmov 1   ;;  %v351_v5 = vmov 2   ;;  %s355_s16 = smov [#allocation2]   ;;  %s430_s1 = inlined_call_operand.vmem [shape: f32[16,6], index: 1, kind: input, shape index: {}]   ;;  %s431_s0 = inlined_call_operand.vmem [shape: f32[3,324], index: 0, kind: input, shape index: {}]   ;;  %s432_s2 = inlined_call_operand.hbm [shape: f32[16,324], index: 2, kind: output, shape index: {}]  }
   0x1   :  { %314 = vset.pattern.permute.xlu1 %v348_v0  ;;  %313 = vset.pattern.permute.xlu0 %v349_v1  ;;  %v374_v2 = vld [vmem:[%s430_s1] sm:$0xff]  ;;  %v381_v3 = vld [vmem:[%s430_s1 + $0x8] sm:$0xff]  ;;  %v27_v6 = vlaneseq  ;;  %vm170_vm0 = vcmask 556032   ;;  %s290_s17 = sshll.u32 %s355_s16, 4  ;;  %s291_s17 = int_to_ptr.vmem [resolvable:$true] %s290_s17 }
   0x2   :  { %61 = vperm.xlu1 %314, %v374_v2   ;;  %17 = vperm.xlu0 %313, %v374_v2   ;;  %v13_v10 = vld [vmem:[%s431_s0] sm:$0x77]  ;;  %v14_v11 = vld [vmem:[%s431_s0 + $0x8] sm:$0x7]  ;;  %s354_s0 = smov 1   ;;  %s326_s18 = scalar_lea.vmem %s291_s17, 768 }
   0x3   :  { %v28_v7 = vshrl.u32 %v27_v6, 7  ;;  %p327_p0 = scmp.ne.s32.totalorder %s291_s17, %s326_s18  ;;  %p331_p1 = scmp.lt.s32.totalorder %s291_s17, %s291_s17 }
   0x4   :  { %p332_p2 = scmp.lt.s32.totalorder %s326_s18, %s326_s18 }
   0x5   :  { %v29_v8 = vsub.s32 0, %v28_v7  ;;  %v33_v9 = vsub.s32 4, %v28_v7  ;;  %v84_v12 = vsub.s32 1, %v28_v7  ;;  %v88_v15 = vsub.s32 5, %v28_v7 }
   0x6   :  { %65 = vperm.xlu1 %314, %v381_v3   ;;  %22 = vperm.xlu0 %313, %v381_v3   ;;  %v131_v19 = vsub.s32 2, %v28_v7  ;;  %v135_v21 = vsub.s32 6, %v28_v7  ;;  %p333_p3 = por %p332_p2, %p331_p1 }
   0x7   :  { %v30_v13 = vrot.slane %v13_v10, %v29_v8  ;;  %v34_v14 = vrot.slane %v13_v10, %v33_v9  ;;  %v38_v18 = vrot.slane %v14_v11, %v29_v8  ;;  %v85_v20 = vrot.slane %v13_v10, %v84_v12 }
   0x8   :  { %v89_v24 = vrot.slane %v13_v10, %v88_v15  ;;  %v93_v25 = vrot.slane %v14_v11, %v84_v12  ;;  %v132_v29 = vrot.slane %v13_v10, %v131_v19  ;;  %v136_v31 = vrot.slane %v13_v10, %v135_v21  ;;  %p334_p4 = pnand %p333_p3, %p327_p0 }
   0x9   :  { %v45_v22 = vrot.slane %v30_v13, %v29_v8  ;;  %v49_v23 = vrot.slane %v34_v14, %v29_v8  ;;  %v53_v26 = vrot.slane %v38_v18, %v29_v8  ;;  %v100_v30 = vrot.slane %v85_v20, %v84_v12 }
   0xa   :  { %316 = vset.pattern.permute.xlu1 %v350_v4  ;;  %315 = vset.pattern.permute.xlu0 %v350_v4  ;;  %v140_v32 = vrot.slane %v14_v11, %v131_v19  ;;  %v104_v35 = vrot.slane %v89_v24, %v84_v12  ;;  %v108_v36 = vrot.slane %v93_v25, %v84_v12 }
   0xb   :  { %79 = vperm.xlu1 %316, %v381_v3   ;;  %75 = vperm.xlu0 %315, %v374_v2   ;;  %v147_v43 = vrot.slane %v132_v29, %v131_v19  ;;  %v151_v46 = vrot.slane %v136_v31, %v131_v19 }
   0xc   :  { %v155_v47 = vrot.slane %v140_v32, %v131_v19 }
   0xf   :  { %317 = vset.pattern.permute.xlu1 %v351_v5  ;;  %318 = vset.pattern.permute.xlu0 %v351_v5 }
  0x10   :  { %122 = vperm.xlu1 %317, %v374_v2   ;;  %126 = vperm.xlu0 %318, %v381_v3  }
  0x7d   :  { %v62_v16 = vpop.permute.xlu1 %61  ;;  %v18_v17 = vpop.permute.xlu0 %17 }
  0x7e   :  { %v54_v33 = vmul.f32 %v45_v22, %v18_v17  ;;  %v55_v34 = vmul.f32 %v49_v23, %v18_v17  ;;  %v56_v37 = vmul.f32 %v53_v26, %v18_v17 }
  0x80   :  { %v68_v48 = vadd.f32 %v62_v16, %v54_v33  ;;  %v69_v49 = vadd.f32 %v62_v16, %v55_v34  ;;  %v70_v52 = vadd.f32 %v62_v16, %v56_v37 }
  0x81   :  { %v66_v27 = vpop.permute.xlu1 %65  ;;  %v23_v28 = vpop.permute.xlu0 %22 }
  0x82   :  { %v57_v38 = vmul.f32 %v45_v22, %v23_v28  ;;  %v58_v39 = vmul.f32 %v49_v23, %v23_v28  ;;  %v59_v40 = vmul.f32 %v53_v26, %v23_v28 }
  0x84   :  { %v71_v53 = vadd.f32 %v66_v27, %v57_v38  ;;  %v72_v56 = vadd.f32 %v66_v27, %v58_v39  ;;  %v73_v57 = vadd.f32 %v66_v27, %v59_v40 }
  0x86   :  { %v80_v41 = vpop.permute.xlu1 %79  ;;  %v76_v42 = vpop.permute.xlu0 %75 }
  0x87   :  { %v112_v44 = vmul.f32 %v100_v30, %v80_v41  ;;  %v109_v45 = vmul.f32 %v100_v30, %v76_v42  ;;  %v110_v50 = vmul.f32 %v104_v35, %v76_v42  ;;  %v111_v51 = vmul.f32 %v108_v36, %v76_v42 }
  0x88   :  { %v113_v54 = vmul.f32 %v104_v35, %v80_v41  ;;  %v114_v55 = vmul.f32 %v108_v36, %v80_v41 }
  0x89   :  { %v118_v58 = vadd.f32 %v112_v44, %v71_v53  ;;  %v115_v59 = vadd.f32 %v109_v45, %v68_v48  ;;  %v116_v60 = vadd.f32 %v110_v50, %v69_v49  ;;  %v117_v61 = vadd.f32 %v111_v51, %v70_v52 }
  0x8a   :  { %v119_v6 = vadd.f32 %v113_v54, %v72_v56  ;;  %v120_v7 = vadd.f32 %v114_v55, %v73_v57  ;;  %v353_v53 = vmov 5  }
  0x8b   :  { %v123_v62 = vpop.permute.xlu1 %122  ;;  %v127_v63 = vpop.permute.xlu0 %126  ;;  %320 = vset.pattern.permute.xlu0 %v353_v53 }
  0x8c   :  { %v156_v0 = vmul.f32 %v147_v43, %v123_v62  ;;  %v157_v1 = vmul.f32 %v151_v46, %v123_v62  ;;  %v158_v4 = vmul.f32 %v155_v47, %v123_v62  ;;  %v159_v5 = vmul.f32 %v147_v43, %v127_v63 }
  0x8d   :  { %v160_v8 = vmul.f32 %v151_v46, %v127_v63  ;;  %v161_v9 = vmul.f32 %v155_v47, %v127_v63  ;;  %v352_v46 = vmov 4  }
  0x8e   :  { %v395_v10 = vadd.f32 %v159_v5, %v118_v58  ;;  %v397_v11 = vadd.f32 %v156_v0, %v115_v59  ;;  %v399_v12 = vadd.f32 %v157_v1, %v116_v60  ;;  %v164_v13 = vadd.f32 %v158_v4, %v117_v61  ;;  %319 = vset.pattern.permute.xlu1 %v352_v46 }
  0x8f   :  { %v401_v14 = vadd.f32 %v160_v8, %v119_v6  ;;  %v167_v15 = vadd.f32 %v161_v9, %v120_v7 }
  0x90   :  { %171 = vst.msk [vmem:[#allocation2 + $0x10] sm:$0xff] %vm170_vm0, %v164_v13  ;;  %v175_v16 = vadd.f32 %v399_v12, %v397_v11  ;;  %v176_v17 = vsel %vm170_vm0, %v164_v13, 0.0 }
  0x91   :  { %174 = vst.msk [vmem:[#allocation2 + $0x28] sm:$0xff] %vm170_vm0, %v167_v15  ;;  %v180_v18 = vadd.f32 %v401_v14, %v395_v10  ;;  %v181_v19 = vsel %vm170_vm0, %v167_v15, 0.0 }
  0x92   :  { %v177_v20 = vadd.f32 %v176_v17, %v175_v16 }
  0x93   :  { %v182_v21 = vadd.f32 %v181_v19, %v180_v18 }
  0x94   :  { %178 = vadd.xlane.f32.xlu1 %v177_v20 }
  0x95   :  { %183 = vadd.xlane.f32.xlu0 %v182_v21 }
  0x97   :  { %v191_v26 = vld [vmem:[#allocation2 + $0x10] sm:$0xff] }
  0x98   :  { %v194_v27 = vld [vmem:[#allocation2 + $0x28] sm:$0xff] }
 0x11d   :  { %v179_v22 = vpop.xlane.xlu1 %178 }
 0x11e   :  { %v184_v23 = vpop.xlane.xlu0 %183  ;;  %v187_v24 = vmul.f32 0.0030864198, %v179_v22 }
 0x11f   :  { %v188_v25 = vmul.f32 0.0030864198, %v184_v23 }
 0x120   :  { %v195_v28 = vsub.f32 %v397_v11, %v187_v24  ;;  %v196_v29 = vsub.f32 %v399_v12, %v187_v24  ;;  %v197_v30 = vsub.f32 %v191_v26, %v187_v24 }
 0x121   :  { %v198_v31 = vsub.f32 %v395_v10, %v188_v25  ;;  %v199_v32 = vsub.f32 %v401_v14, %v188_v25  ;;  %v200_v33 = vsub.f32 %v194_v27, %v188_v25 }
 0x122   :  { %v201_v34 = vmul.f32 %v195_v28, %v195_v28  ;;  %v202_v35 = vmul.f32 %v196_v29, %v196_v29  ;;  %v203_v36 = vmul.f32 %v197_v30, %v197_v30 }
 0x123   :  { %v204_v37 = vmul.f32 %v198_v31, %v198_v31  ;;  %v205_v38 = vmul.f32 %v199_v32, %v199_v32  ;;  %v206_v39 = vmul.f32 %v200_v33, %v200_v33 }
 0x124   :  { %v207_v40 = vadd.f32 %v202_v35, %v201_v34  ;;  %v208_v41 = vsel %vm170_vm0, %v203_v36, 0.0 }
 0x125   :  { %v212_v42 = vadd.f32 %v205_v38, %v204_v37  ;;  %v213_v43 = vsel %vm170_vm0, %v206_v39, 0.0 }
 0x126   :  { %v209_v44 = vadd.f32 %v208_v41, %v207_v40 }
 0x127   :  { %v214_v45 = vadd.f32 %v213_v43, %v212_v42 }
 0x128   :  { %210 = vadd.xlane.f32.xlu1 %v209_v44 }
 0x129   :  { %215 = vadd.xlane.f32.xlu0 %v214_v45 }
 0x1b1   :  { %v211_v47 = vpop.xlane.xlu1 %210 }
 0x1b2   :  { %v216_v48 = vpop.xlane.xlu0 %215  ;;  %v219_v49 = vmul.f32 0.0030864198, %v211_v47 }
 0x1b3   :  { %v220_v50 = vmul.f32 0.0030864198, %v216_v48 }
 0x1b4   :  { %v221_v51 = vadd.f32 1e-05, %v219_v49 }
 0x1b5   :  { %v222_v52 = vadd.f32 1e-05, %v220_v50 }
 0x1b6   :  { %322 = vrsqrt.f32 %v221_v51 }
 0x1b7   :  { %324 = vrsqrt.f32 %v222_v52 }
 0x1c3   :  { %v323_v54 = vpop.eup %322 }
 0x1c4   :  { %v325_v55 = vpop.eup %324  ;;  %v225_v56 = vmul.f32 %v323_v54, %v374_v2 }
 0x1c5   :  { %v226_v57 = vmul.f32 %v325_v55, %v381_v3 }
 0x1c6   :  { %v227_v58 = vmul.f32 %v225_v56, %v187_v24 }
 0x1c7   :  { %v228_v59 = vmul.f32 %v226_v57, %v188_v25 }
 0x1c8   :  { %231 = vrot.lane.b32.xlu1 %v227_v58, %s354_s0 }
 0x1c9   :  { %233 = vrot.lane.b32.xlu0 %v228_v59, %s354_s0 }
 0x1cc   :  { %241 = vperm.xlu1 %319, %v225_v56  }
 0x1d0   :  { %246 = vperm.xlu1 %319, %v226_v57  }
 0x1d4   :  { %321 = vset.pattern.permute.xlu1 %v353_v53 }
 0x23a   :  { %v232_v60 = vpop.permute.xlu1 %231 }
 0x23b   :  { %v234_v61 = vpop.permute.xlu0 %233  ;;  %v237_v62 = vsub.f32 %v374_v2, %v232_v60 }
 0x23c   :  { %v238_v63 = vsub.f32 %v381_v3, %v234_v61 }
 0x23d   :  { %257 = vperm.xlu0 %320, %v237_v62  }
 0x23e   :  { %262 = vperm.xlu1 %321, %v238_v63  }
 0x247   :  { %v242_v0 = vpop.permute.xlu1 %241 }
 0x248   :  { %v249_v4 = vmul.f32 %v242_v0, %v397_v11  ;;  %v250_v5 = vmul.f32 %v242_v0, %v399_v12  ;;  %v251_v6 = vmul.f32 %v242_v0, %v191_v26 }
 0x24b   :  { %v247_v1 = vpop.permute.xlu1 %246 }
 0x24c   :  { %v252_v7 = vmul.f32 %v247_v1, %v395_v10  ;;  %v253_v8 = vmul.f32 %v247_v1, %v401_v14  ;;  %v254_v9 = vmul.f32 %v247_v1, %v194_v27 }
 0x2b8   :  { %v258_v13 = vpop.permute.xlu0 %257 }
 0x2b9   :  { %v265_v15 = vadd.f32 %v258_v13, %v249_v4  ;;  %v266_v16 = vadd.f32 %v258_v13, %v250_v5  ;;  %v267_v2 = vadd.f32 %v258_v13, %v251_v6  ;;  %v263_v17 = vpop.permute.xlu1 %262 }
 0x2ba   :  { %v268_v3 = vadd.f32 %v263_v17, %v252_v7  ;;  %v269_v18 = vadd.f32 %v263_v17, %v253_v8  ;;  %v270_v19 = vadd.f32 %v263_v17, %v254_v9 }
 0x2bb   :  { %v271_v20 = vmax.f32 %v265_v15, 0.0  ;;  %v272_v11 = vmax.f32 %v266_v16, 0.0  ;;  %v273_v21 = vmax.f32 %v267_v2, 0.0 }
 0x2bc   :  { %v274_v12 = vmax.f32 %v268_v3, 0.0  ;;  %v275_v22 = vmax.f32 %v269_v18, 0.0  ;;  %v276_v23 = vmax.f32 %v270_v19, 0.0 }
 0x2bd   :  { %277 = vst [vmem:[#allocation2] sm:$0xff] %v271_v20  ;;  %278 = vst [vmem:[#allocation2 + $0x8] sm:$0xff] %v272_v11 }
 0x2be   :  { %279 = vst.msk [vmem:[#allocation2 + $0x10] sm:$0xff] %vm170_vm0, %v273_v21  ;;  %280 = vst [vmem:[#allocation2 + $0x18] sm:$0xff] %v274_v12 }
 0x2bf   :  { %281 = vst [vmem:[#allocation2 + $0x20] sm:$0xff] %v275_v22  ;;  %282 = vst.msk [vmem:[#allocation2 + $0x28] sm:$0xff] %vm170_vm0, %v276_v23 }
 0x2c0   :  { %337 = shalt.err (!%p334_p4)  }
 0x2c1   :  { %293 = dma.vmem_to_hbm [thread:$0]  %s291_s17, 768, %s432_s2, [#allocation3] }
 0x2c2   :  { %346 = dma.done.wait [#allocation3], 768 }
 0x2c3   :  { %347 = vsyncadd [#allocation3], 4294966528 }
 0x2c4   :  { %298 = vsyncmov [#allocation3] }
 0x2c7   :  { %s299_s21 = vpop.sfrf %298 }
 0x2c8   :  { %p304_p5 = scmp.ne.s32.totalorder %s299_s21, 0 }
 0x2ca   :  { %303 = shalt.err (%p304_p5)  }

</bundles_post_ra>
